<compile_context>
chip_gen: v7x
topology: tpu7x:2x2x1
jax: 0.10.0
libtpu: 0.0.40
codegen_flags: <defaults>
</compile_context>

<pallas_src>
import jax
import jax.numpy as jnp
from jax.experimental import pallas as pl
from jax.experimental.pallas import tpu as pltpu


def _linear_kernel(x_ref, w_ref, b_ref, y_ref):
    # One row tile: y = x @ w + b.  x/w are bf16, the MXU accumulates in f32,
    # the bias is added in f32, and there is a single cast to the out dtype.
    acc = jnp.dot(x_ref[...], w_ref[...], preferred_element_type=jnp.float32)
    y_ref[...] = (acc + b_ref[...]).astype(y_ref.dtype)


def _largest_divisor_leq(n, cap):
    for g in range(min(n, cap), 0, -1):
        if n % g == 0:
            return g
    return 1


def _linear_2d(x2, w, b, *, vmem_stream_budget=12 * 1024 * 1024):
    """y = x2 @ w + b for x2:(N, F_in), w:(F_in, F_out), b:(1, F_out)."""
    n_rows, f_in = x2.shape
    f_in_w, f_out = w.shape
    assert f_in == f_in_w, (f_in, f_in_w)
    out_dtype = x2.dtype

    # ---- lane-dense packing: fold G rows into the lane axis ---------------
    # Largest divisor of N with G*F_out <= 128: free row-major reshape, no
    # padding, output block last dim approaches full 128-lane density.
    g_max = max(1, 128 // f_out)
    g = _largest_divisor_leq(n_rows, g_max)
    packed_rows = n_rows // g

    # Streamed operands in bf16 (MXU native on v5e/v6e/v7x).  Under jit the
    # convert fuses into x's producer; callers holding bf16 activations skip
    # it entirely.  Bias stays f32 for the f32 accumulate.
    x_p = x2.astype(jnp.bfloat16).reshape(packed_rows, g * f_in)
    w_big = jnp.kron(jnp.eye(g, dtype=w.dtype), w).astype(jnp.bfloat16)
    b_big = jnp.tile(b.reshape(1, f_out).astype(jnp.float32), (1, g))

    # ---- row-tile selection ------------------------------------------------
    out_itemsize = jnp.dtype(out_dtype).itemsize
    row_bytes = g * f_in * 2 + g * f_out * out_itemsize   # streamed bytes/row
    if packed_rows < 16:
        tile = packed_rows                   # single full-extent block
    else:
        # Biggest tile that keeps the double-buffered streams inside the VMEM
        # budget, but at least two grid steps so v7x's two TensorCores can
        # split the "parallel" row axis.
        budget_tile = max(8, (vmem_stream_budget // (2 * row_bytes)) // 8 * 8)
        half = ((pl.cdiv(packed_rows, 2) + 7) // 8) * 8
        tile = min(budget_tile, half)
    n_steps = pl.cdiv(packed_rows, tile)

    cost = pl.CostEstimate(
        flops=2 * packed_rows * (g * f_in) * (g * f_out),
        transcendentals=0,
        bytes_accessed=(x_p.size * 2
                        + n_steps * w_big.size * 2
                        + n_steps * b_big.size * 4
                        + packed_rows * g * f_out * out_itemsize),
    )

    y_p = pl.pallas_call(
        _linear_kernel,
        out_shape=jax.ShapeDtypeStruct((packed_rows, g * f_out), out_dtype),
        grid_spec=pltpu.PrefetchScalarGridSpec(
            num_scalar_prefetch=0,
            grid=(n_steps,),
            in_specs=[
                pl.BlockSpec((tile, g * f_in), lambda i: (i, 0)),
                pl.BlockSpec((g * f_in, g * f_out), lambda i: (0, 0)),
                pl.BlockSpec((1, g * f_out), lambda i: (0, 0)),
            ],
            out_specs=pl.BlockSpec((tile, g * f_out), lambda i: (i, 0)),
        ),
        compiler_params=pltpu.CompilerParams(
            dimension_semantics=("parallel",),       # independent row tiles
            vmem_limit_bytes=32 * 1024 * 1024),
        cost_estimate=cost,
    )(x_p, w_big, b_big)

    # (N/G, G*F_out) -> (N, F_out): free row-major reshape.
    return y_p.reshape(n_rows, f_out)


def time_distributed_linear(x, w, b, *, batch_first=True):
    """Pallas equivalent of TimeDistributed(nn.Linear(F_in, F_out))(x).

    x: (..., F_in).  w: (F_in, F_out) (transposed vs PyTorch's (F_out, F_in)).
    b: (1, F_out) or (F_out,).
    """
    f_out = w.shape[1]

    # len(x.size()) <= 2  ->  apply the module directly.
    if x.ndim <= 2:
        x2 = x.reshape((-1, x.shape[-1]))
        y = _linear_2d(x2, w, b)
        return y.reshape(x.shape[:-1] + (f_out,))

    # x_reshape = x.contiguous().view(-1, x.size(-1))   (free reshape in JAX)
    n_rows = 1
    for d in x.shape[:-1]:
        n_rows *= d
    x2 = x.reshape((n_rows, x.shape[-1]))
    y = _linear_2d(x2, w, b)                           # (n_rows, F_out)

    if batch_first:
        return y.reshape((x.shape[0], -1, f_out))      # (B, T, F_out)
    return y.reshape((-1, x.shape[1], f_out))          # (T, B, F_out)


def _ref_time_distributed(x, w, b, *, batch_first=True):
    f_out = w.shape[1]
    if x.ndim <= 2:
        return (x.reshape((-1, x.shape[-1])) @ w + b.reshape(1, -1)).reshape(
            x.shape[:-1] + (f_out,))
    y = x.reshape((-1, x.shape[-1])) @ w + b.reshape(1, -1)
    if batch_first:
        return y.reshape((x.shape[0], -1, f_out))
    return y.reshape((-1, x.shape[1], f_out))


if __name__ == "__main__":
    # Shapes implied by the model: (batch=2, seq=8, hidden=32) -> n_features=4
    B, T, F_IN, F_OUT = 2, 8, 32, 4

    key = jax.random.PRNGKey(0)
    kx, kw, kb = jax.random.split(key, 3)

    # Round x/w to bf16-representable values (kept in f32) so the explicit
    # bf16 streaming in the kernel is lossless and comparable to the f32 ref.
    x = jax.random.normal(kx, (B, T, F_IN), jnp.float32)
    x = x.astype(jnp.bfloat16).astype(jnp.float32)
    bound = 1.0 / jnp.sqrt(F_IN)
    w = jax.random.uniform(kw, (F_IN, F_OUT), jnp.float32, -bound, bound)
    w = w.astype(jnp.bfloat16).astype(jnp.float32)
    b = jax.random.uniform(kb, (1, F_OUT), jnp.float32, -bound, bound)

    # 3-D path, batch_first=True (as used in the model).
    y = jax.block_until_ready(time_distributed_linear(x, w, b, batch_first=True))
    assert y.shape == (B, T, F_OUT), y.shape
    ref = _ref_time_distributed(x, w, b, batch_first=True)
    assert jnp.allclose(y, ref, atol=1e-4, rtol=1e-4), \
        float(jnp.max(jnp.abs(y - ref)))

    # 3-D path, batch_first=False (module default).
    y_nf = jax.block_until_ready(
        time_distributed_linear(x, w, b, batch_first=False))
    ref_nf = _ref_time_distributed(x, w, b, batch_first=False)
    assert y_nf.shape == ref_nf.shape, (y_nf.shape, ref_nf.shape)
    assert jnp.allclose(y_nf, ref_nf, atol=1e-4, rtol=1e-4), \
        float(jnp.max(jnp.abs(y_nf - ref_nf)))

    # 2-D path (len(x.size()) <= 2 branch of the module).
    x2d = x[:, 0, :]
    y2 = jax.block_until_ready(time_distributed_linear(x2d, w, b))
    ref2 = _ref_time_distributed(x2d, w, b)
    assert y2.shape == (B, F_OUT), y2.shape
    assert jnp.allclose(y2, ref2, atol=1e-4, rtol=1e-4), \
        float(jnp.max(jnp.abs(y2 - ref2)))

    print("KERNEL_OK")
</pallas_src>

<mosaic_0001>
module attributes {stable_mosaic.version = 11 : i64} {
  func.func @_linear_kernel(%arg0: i32, %arg1: memref<1x512xbf16, #tpu.memory_space<vmem>>, %arg2: memref<512x64xbf16, #tpu.memory_space<vmem>>, %arg3: memref<1x64xf32, #tpu.memory_space<vmem>>, %arg4: memref<1x64xf32, #tpu.memory_space<vmem>>) attributes {dimension_semantics = [#tpu.dimension_semantics<parallel>], iteration_bounds = array<i64: 1>, scalar_prefetch = 0 : i64, scratch_operands = 0 : i64, tpu.core_type = #tpu.core_type<tc>, window_params = [{transform_indices = @transform_0, window_bounds = array<i64: 1, 512>}, {pipeline_mode = #tpu.pipeline_mode<synchronous>, transform_indices = @transform_1, window_bounds = array<i64: 512, 64>}, {pipeline_mode = #tpu.pipeline_mode<synchronous>, transform_indices = @transform_2, window_bounds = array<i64: 1, 64>}, {transform_indices = @transform_3, window_bounds = array<i64: 1, 64>}]} {
    %c0 = arith.constant 0 : index
    %c0_0 = arith.constant 0 : index
    %0 = vector.load %arg1[%c0, %c0_0] : memref<1x512xbf16, #tpu.memory_space<vmem>>, vector<1x512xbf16>
    %c0_1 = arith.constant 0 : index
    %c0_2 = arith.constant 0 : index
    %1 = vector.load %arg2[%c0_1, %c0_2] : memref<512x64xbf16, #tpu.memory_space<vmem>>, vector<512x64xbf16>
    %cst = arith.constant dense<0.000000e+00> : vector<1x64xf32>
    %2 = tpu.matmul %0, %1, %cst {dimension_numbers = #tpu.dot_dimension_numbers<[1], [0], [0], [1], [0, 0, 1, 1], [], []>} : vector<1x512xbf16>, vector<512x64xbf16>, vector<1x64xf32> -> vector<1x64xf32>
    %c0_3 = arith.constant 0 : index
    %c0_4 = arith.constant 0 : index
    %3 = vector.load %arg3[%c0_3, %c0_4] : memref<1x64xf32, #tpu.memory_space<vmem>>, vector<1x64xf32>
    %4 = arith.addf %2, %3 : vector<1x64xf32>
    %c0_5 = arith.constant 0 : index
    %c0_6 = arith.constant 0 : index
    %5 = vector.load %arg4[%c0_5, %c0_6] : memref<1x64xf32, #tpu.memory_space<vmem>>, vector<1x64xf32>
    tpu.vector_store %arg4[%c0_5, %c0_6], %4 {strides = array<i32>} : memref<1x64xf32, #tpu.memory_space<vmem>>, vector<1x64xf32>,
    return
  }
  func.func @transform_0(%arg0: i32) -> (i32, i32) {
    %c0_i32 = arith.constant 0 : i32
    %c0_i32_0 = arith.constant 0 : i32
    return %arg0, %c0_i32 : i32, i32
  }
  func.func @transform_1(%arg0: i32) -> (i32, i32) {
    %c0_i32 = arith.constant 0 : i32
    %c0_i32_0 = arith.constant 0 : i32
    %c0_i32_1 = arith.constant 0 : i32
    return %c0_i32, %c0_i32_0 : i32, i32
  }
  func.func @transform_2(%arg0: i32) -> (i32, i32) {
    %c0_i32 = arith.constant 0 : i32
    %c0_i32_0 = arith.constant 0 : i32
    %c0_i32_1 = arith.constant 0 : i32
    return %c0_i32, %c0_i32_0 : i32, i32
  }
  func.func @transform_3(%arg0: i32) -> (i32, i32) {
    %c0_i32 = arith.constant 0 : i32
    %c0_i32_0 = arith.constant 0 : i32
    return %arg0, %c0_i32 : i32, i32
  }
}

</mosaic_0001>

<bundles_post_ra>
// kernel: tpu_custom_call.1
= control target key start
LH: loop header
LB: loop body
LE: loop exit
PB: predicated region body
PF: predicated region fallthrough
CT: control target
= control target key end

     0   :  { %v94_v30 = vlaneseq  ;;  %v534_v34 = vmov 1966171168   ;;  %s670_s0 = inlined_call_operand.vmem [shape: bf16[1,512], index: 0, kind: input, shape index: {}]   ;;  %s671_s1 = inlined_call_operand.vmem [shape: bf16[512,64], index: 1, kind: input, shape index: {}]   ;;  %s672_s2 = inlined_call_operand.vmem [shape: f32[1,64], index: 2, kind: input, shape index: {}]   ;;  %s673_s3 = inlined_call_operand.hbm [shape: f32[1,64], index: 3, kind: output, shape index: {}]  }
   0x1   :  { %v478_v0 = vld [vmem:[%s671_s1 + $0x40] sm:$0xff]   ;;  %v482_v4 = vld [vmem:[%s671_s1 + $0x48] sm:$0xff]   ;;  %v486_v8 = vld [vmem:[%s671_s1 + $0x50] sm:$0xff]   ;;  %v92_v35 = vunpack.c.l.s4 %v534_v34 }
   0x2   :  { %v479_v1 = vld [vmem:[%s671_s1 + $0xc0] sm:$0xff]   ;;  %432 = vmatprep.subr.bf16.mxu0 %v478_v0  ;;  %v483_v5 = vld [vmem:[%s671_s1 + $0xc8] sm:$0xff]   ;;  %v487_v9 = vld [vmem:[%s671_s1 + $0xd0] sm:$0xff]   ;;  %v95_v36 = vshrl.u32 %v94_v30, 7 }
   0x3   :  { %v480_v2 = vld [vmem:[%s671_s1] sm:$0xff]   ;;  %454 = vmatprep.subr.bf16.mxu1 %v479_v1  ;;  %v484_v6 = vld [vmem:[%s671_s1 + $0x8] sm:$0xff]   ;;  %v488_v10 = vld [vmem:[%s671_s1 + $0x10] sm:$0xff]  }
   0x4   :  { %v481_v3 = vld [vmem:[%s671_s1 + $0x80] sm:$0xff]   ;;  %433 = vmatpush3.bf16.msra.mxu0 %v480_v2  ;;  %v485_v7 = vld [vmem:[%s671_s1 + $0x88] sm:$0xff]   ;;  %v489_v11 = vld [vmem:[%s671_s1 + $0x90] sm:$0xff]  }
   0x5   :  { %455 = vmatpush3.bf16.msra.mxu1 %v481_v3  ;;  %434 = vmatprep.subr.bf16.mxu0 %v482_v4  ;;  %v490_v12 = vld [vmem:[%s671_s1 + $0x58] sm:$0xff]   ;;  %v494_v16 = vld [vmem:[%s671_s1 + $0x60] sm:$0xff]   ;;  %v498_v20 = vld [vmem:[%s671_s1 + $0x68] sm:$0xff]  }
   0x6   :  { %456 = vmatprep.subr.bf16.mxu1 %v483_v5  ;;  %v491_v13 = vld [vmem:[%s671_s1 + $0xd8] sm:$0xff]   ;;  %v495_v17 = vld [vmem:[%s671_s1 + $0xe0] sm:$0xff]   ;;  %v499_v21 = vld [vmem:[%s671_s1 + $0xe8] sm:$0xff]  }
   0x7   :  { %v492_v14 = vld [vmem:[%s671_s1 + $0x18] sm:$0xff]   ;;  %v496_v18 = vld [vmem:[%s671_s1 + $0x20] sm:$0xff]   ;;  %v500_v22 = vld [vmem:[%s671_s1 + $0x28] sm:$0xff]  }
   0x8   :  { %435 = vmatpush3.bf16.msra.mxu0 %v484_v6  ;;  %v493_v15 = vld [vmem:[%s671_s1 + $0x98] sm:$0xff]   ;;  %v497_v19 = vld [vmem:[%s671_s1 + $0xa0] sm:$0xff]   ;;  %v501_v23 = vld [vmem:[%s671_s1 + $0xa8] sm:$0xff]  }
   0x9   :  { %457 = vmatpush3.bf16.msra.mxu1 %v485_v7  ;;  %436 = vmatprep.subr.bf16.mxu0 %v486_v8  ;;  %v502_v24 = vld [vmem:[%s671_s1 + $0x70] sm:$0xff]   ;;  %v506_v28 = vld [vmem:[%s671_s1 + $0x78] sm:$0xff]   ;;  %v399_v33 = vld.sshfl [vmem:[%s670_s0] sm:$0x33 pattern:$0x75316420] }
   0xa   :  { %458 = vmatprep.subr.bf16.mxu1 %v487_v9  ;;  %v503_v25 = vld [vmem:[%s671_s1 + $0xf0] sm:$0xff]   ;;  %v507_v29 = vld [vmem:[%s671_s1 + $0xf8] sm:$0xff]  }
   0xb   :  { %v504_v26 = vld [vmem:[%s671_s1 + $0x30] sm:$0xff]   ;;  %v508_v31 = vld [vmem:[%s671_s1 + $0x38] sm:$0xff]  }
   0xc   :  { %437 = vmatpush3.bf16.msra.mxu0 %v488_v10  ;;  %v505_v27 = vld [vmem:[%s671_s1 + $0xb0] sm:$0xff]   ;;  %v509_v32 = vld [vmem:[%s671_s1 + $0xb8] sm:$0xff]  }
   0xd   :  { %459 = vmatpush3.bf16.msra.mxu1 %v489_v11  ;;  %438 = vmatprep.subr.bf16.mxu0 %v490_v12 }
   0xe   :  { %460 = vmatprep.subr.bf16.mxu1 %v491_v13 }
  0x10   :  { %439 = vmatpush3.bf16.msra.mxu0 %v492_v14 }
  0x11   :  { %461 = vmatpush3.bf16.msra.mxu1 %v493_v15  ;;  %440 = vmatprep.subr.bf16.mxu0 %v494_v16 }
  0x12   :  { %462 = vmatprep.subr.bf16.mxu1 %v495_v17 }
  0x14   :  { %441 = vmatpush3.bf16.msra.mxu0 %v496_v18 }
  0x15   :  { %463 = vmatpush3.bf16.msra.mxu1 %v497_v19  ;;  %442 = vmatprep.subr.bf16.mxu0 %v498_v20 }
  0x16   :  { %464 = vmatprep.subr.bf16.mxu1 %v499_v21 }
  0x18   :  { %443 = vmatpush3.bf16.msra.mxu0 %v500_v22 }
  0x19   :  { %465 = vmatpush3.bf16.msra.mxu1 %v501_v23  ;;  %444 = vmatprep.subr.bf16.mxu0 %v502_v24 }
  0x1a   :  { %466 = vmatprep.subr.bf16.mxu1 %v503_v25 }
  0x1c   :  { %445 = vmatpush3.bf16.msra.mxu0 %v504_v26 }
  0x1d   :  { %467 = vmatpush3.bf16.msra.mxu1 %v505_v27  ;;  %446 = vmatprep.subr.bf16.mxu0 %v506_v28 }
  0x1e   :  { %468 = vmatprep.subr.bf16.mxu1 %v507_v29 }
  0x20   :  { %447 = vmatpush3.bf16.msra.mxu0 %v508_v31 }
  0x21   :  { %469 = vmatpush3.bf16.msra.mxu1 %v509_v32 }
  0x22   :  { %8 = vsyncpa [#allocation3], 0  ;;  %v90_v37 = vcombine.high %v399_v33, %v399_v33  ;;  %v93_v38 = vunpack.c.0.s8 %v92_v35  ;;  %v81_v45 = vld [vmem:[%s672_s2] sm:$0x1]  ;;  %s535_s0 = smov [#allocation2]   ;;  %vm383_vm0 = vcmask 516096  }
  0x23   :  { %s391_s25 = sshll.u32 %s535_s0, 4  ;;  %s392_s25 = int_to_ptr.vmem [resolvable:$true] %s391_s25 }
  0x24   :  { %v96_v39 = vsub.s32 %v93_v38, %v95_v36  ;;  %s510_s26 = scalar_lea.vmem %s392_s25, 16  ;;  %s514_s27 = scalar_lea.vmem %s392_s25, 32 }
  0x25   :  { %p511_p0 = scmp.ne.s32.totalorder %s392_s25, %s510_s26  ;;  %p515_p1 = scmp.lt.s32.totalorder %s392_s25, %s392_s25 }
  0x26   :  { %v104_v40 = vrot.slane %v90_v37, %v96_v39  ;;  %v97_v41 = vrot.slane %v399_v33, %v96_v39  ;;  %p516_p2 = scmp.lt.s32.totalorder %s514_s27, %s510_s26 }
  0x28   :  { %335 = vmatprep.mubr.bf16.mxu0 %v104_v40  ;;  %v106_v42 = vcombine.high %v104_v40, %v104_v40  ;;  %v105_v43 = vcombine.high %v97_v41, %v97_v41  ;;  %p517_p3 = por %p516_p2, %p515_p1 }
  0x29   :  { %336 = vmatmul.mubr.bf16.vlgmr.msra.gmra.mrb[0].mxu0 %v97_v41 }
  0x2a   :  { %375 = vmatprep.mubr.bf16.mxu1 %v106_v42  ;;  %p518_p4 = pnand %p517_p3, %p511_p0 }
  0x2b   :  { %376 = vmatmul.mubr.bf16.vlgmr.msra.gmra.mrb[0].mxu1 %v105_v43 }
  0xfc   :  { %v448_v44 = vpop.f32.mrb[0].mxu0 }
  0xfd   :  { %v449_v46 = vpop.f32.mrb[1].mxu0 }
  0xfe   :  { %v470_v47 = vpop.f32.mrb[0].mxu1  ;;  %v450_v48 = vadd.f32 %v449_v46, %v448_v44  ;;  %v451_v49 = vpop.f32.mrb[2].mxu0 }
  0xff   :  { %v471_v50 = vpop.f32.mrb[1].mxu1  ;;  %v452_v51 = vpop.f32.mrb[3].mxu0 }
 0x100   :  { %v338_v52 = vadd.f32 %v450_v48, %v81_v45  ;;  %v472_v53 = vadd.f32 %v471_v50, %v470_v47  ;;  %v473_v54 = vpop.f32.mrb[2].mxu1 }
 0x101   :  { %v474_v55 = vpop.f32.mrb[3].mxu1 }
 0x102   :  { %v378_v56 = vadd.f32 %v472_v53, %v338_v52 }
 0x104   :  { %384 = vst.msk [vmem:[#allocation2] sm:$0x1] %vm383_vm0, %v378_v56 }
 0x105   :  { %521 = shalt.err (!%p518_p4)
}
 0x106   :  { %s522_s29 = scalar_lea.hbm %s673_s3, 16 }
 0x107   :  { %p523_p5 = scmp.ne.s32.totalorder %s673_s3, %s522_s29  ;;  %p526_p6 = scmp.lt.u32.totalorder %s522_s29, %s673_s3 }
 0x109   :  { %p528_p7 = pnand %p526_p6, %p523_p5 }
 0x10b   :  { %531 = shalt.err (!%p528_p7)
}
 0x10c   :  { %394 = dma.vmem_to_hbm [thread:$0]  %s392_s25, 16, %s673_s3, [#allocation3]  }
 0x10d   :  { %532 = dma.done.wait [#allocation3], 16  }
 0x10e   :  { %533 = vsyncadd [#allocation3], 4294967280 }
 0x10f   :  { %398 = vsyncpa [#allocation3], 1 }

</bundles_post_ra>
